<compile_context>
chip_gen: v7x
topology: tpu7x:2x2x1
jax: 0.10.0
libtpu: 0.0.40
codegen_flags: <defaults>
</compile_context>

<pallas_src>
import jax
import jax.numpy as jnp
from jax import lax
from jax.experimental import pallas as pl
from jax.experimental.pallas import tpu as pltpu


def _make_net_kernel(tc_eff: int, num_chunks: int):
    """Builds the kernel for one (4, tb) feature-major batch tile -> (3, tb)."""

    def kernel(x_ref, w1_ref, b1_ref, w2_ref, b2_ref, o_ref):
        # Resident parameters (constant index_maps keep them in VMEM across
        # the whole grid).
        w1 = w1_ref[...]      # (16, 4)
        b1 = b1_ref[...]      # (16, 1)
        w2 = w2_ref[...]      # (3, 16)
        b2 = b2_ref[...]      # (3, 1)

        def process(x):
            # x: (4, n) f32, lanes = batch.
            z1 = jnp.dot(w1, x, preferred_element_type=jnp.float32) + b1
            # sigmoid(z) = 0.5*(tanh(z/2)+1): exactly one EUP op per element
            # (instead of exp + divide) -- matters once HBM traffic is reduced
            # and the EUP becomes the binding unit (v7x).
            h = 0.5 * (jnp.tanh(0.5 * z1) + 1.0)
            z2 = jnp.dot(w2, h, preferred_element_type=jnp.float32) + b2

            # 3-way log-softmax with only 2 exps: the max term contributes
            # exp(0)=1; the "mid" value is recovered exactly as sum-max-min.
            # Pure VPU/EUP on lane-dense data, no XLU cross-sublane reduce.
            l0, l1, l2 = z2[0:1, :], z2[1:2, :], z2[2:3, :]
            m = jnp.maximum(jnp.maximum(l0, l1), l2)
            mn = jnp.minimum(jnp.minimum(l0, l1), l2)
            md = (l0 + l1 + l2) - m - mn
            lse = m + jnp.log(1.0 + jnp.exp(mn - m) + jnp.exp(md - m))
            return z2 - lse

        if num_chunks == 1:
            x = x_ref[...].astype(jnp.float32)          # supports bf16 inputs
            o_ref[...] = process(x).astype(o_ref.dtype)
        else:
            # Inner lane-chunk loop: the DMA tile (tb lanes) is huge so the
            # per-grid-step overhead amortizes, but the compute working set
            # stays at ~(16, tc) f32 (~1 MiB), avoiding VMEM blowup/spills.
            def body(ci, carry):
                off = pl.multiple_of(ci * tc_eff, tc_eff)
                x = x_ref[:, pl.ds(off, tc_eff)].astype(jnp.float32)
                o_ref[:, pl.ds(off, tc_eff)] = process(x).astype(o_ref.dtype)
                return carry

            lax.fori_loop(0, num_chunks, body, 0)

    return kernel


def net_forward_fm(x_fm, w1, b1, w2, b2, *, tb=131072, tc=2048,
                   out_dtype=jnp.float32):
    """Feature-major forward: x_fm is (4, B); returns (3, B) log-probs.

    Recommended entry point: no layout (pad/transpose) HBM passes.
    w1: (16, 4), b1: (16,), w2: (3, 16), b2: (3,)  -- PyTorch (out, in) layout.
    """
    f_in, B = x_fm.shape
    assert f_in == 4

    w1f = w1.astype(jnp.float32)
    w2f = w2.astype(jnp.float32)
    b1c = b1.reshape(16, 1).astype(jnp.float32)
    b2c = b2.reshape(3, 1).astype(jnp.float32)

    # ---- batch tiling ----------------------------------------------------
    tc_req = max(128, (tc // 128) * 128)            # lane chunk, multiple of 128
    tb_m = max(tc_req, (tb // tc_req) * tc_req)     # tile = multiple of chunk
    if B <= tc_req:
        # Single full-extent block: no masking, no inner loop.
        tb_eff, tc_eff = B, B
    else:
        tc_eff = tc_req
        # Aim for >=2 grid steps so ("parallel",) can split the batch across
        # the two v7x TensorCores; the final partial block's stores are
        # masked by Pallas, so no wrapper-side padding is needed.
        half = pl.cdiv(pl.cdiv(B, 2), tc_eff) * tc_eff
        tb_eff = max(tc_eff, min(tb_m, half))
    num_chunks = tb_eff // tc_eff
    grid = (pl.cdiv(B, tb_eff),)

    kernel = _make_net_kernel(tc_eff, num_chunks)

    return pl.pallas_call(
        kernel,
        out_shape=jax.ShapeDtypeStruct((3, B), out_dtype),
        grid=grid,
        in_specs=[
            pl.BlockSpec((4, tb_eff), lambda i: (0, i)),   # x tile, lanes=batch
            pl.BlockSpec((16, 4), lambda i: (0, 0)),       # W1 resident
            pl.BlockSpec((16, 1), lambda i: (0, 0)),       # b1 resident
            pl.BlockSpec((3, 16), lambda i: (0, 0)),       # W2 resident
            pl.BlockSpec((3, 1), lambda i: (0, 0)),        # b2 resident
        ],
        out_specs=pl.BlockSpec((3, tb_eff), lambda i: (0, i)),
        compiler_params=pltpu.CompilerParams(
            dimension_semantics=("parallel",),             # megacore on v7x
            # ~17 MiB in use at tb=131072 (2x input + 2x output buffers plus
            # chunked intermediates); 32 MiB is safe on v5e/v6e/v7x.
            vmem_limit_bytes=32 * 1024 * 1024,
        ),
    )(x_fm, w1f, b1c, w2f, b2c)


def net_forward(x, w1, b1, w2, b2, **kwargs):
    """PyTorch-convention forward: x is (B, 4); returns (B, 3) log-probs.

    Note: the two boundary transposes each cost a full HBM pass executed as
    separate XLA ops; when the producer/consumer can handle feature-major
    (4, B)/(3, B) layouts, call net_forward_fm directly (~3x less end-to-end
    HBM traffic).
    """
    return net_forward_fm(x.T, w1, b1, w2, b2, **kwargs).T


def init_params(key):
    """Deterministic init mimicking PyTorch nn.Linear defaults
    (uniform(-1/sqrt(fan_in), 1/sqrt(fan_in))), PyTorch (out, in) layout."""
    k1, k2, k3, k4 = jax.random.split(key, 4)
    lim1 = 1.0 / jnp.sqrt(4.0)
    lim2 = 1.0 / jnp.sqrt(16.0)
    w1 = jax.random.uniform(k1, (16, 4), jnp.float32, -lim1, lim1)
    b1 = jax.random.uniform(k2, (16,), jnp.float32, -lim1, lim1)
    w2 = jax.random.uniform(k3, (3, 16), jnp.float32, -lim2, lim2)
    b2 = jax.random.uniform(k4, (3,), jnp.float32, -lim2, lim2)
    return w1, b1, w2, b2


if __name__ == "__main__":
    key = jax.random.PRNGKey(0)
    kx, kp = jax.random.split(key)

    w1, b1, w2, b2 = init_params(kp)

    def reference(x):
        h = jax.nn.sigmoid(x @ w1.T + b1)
        return jax.nn.log_softmax(h @ w2.T + b2, axis=1)

    # Small batch, PyTorch (B, 4) convention.
    B = 8
    x = jax.random.normal(kx, (B, 4), jnp.float32)
    out = jax.block_until_ready(net_forward(x, w1, b1, w2, b2))
    assert out.shape == (B, 3)
    assert jnp.allclose(out, reference(x), atol=1e-4, rtol=1e-4)

    # Feature-major fast path (recommended production layout).
    out_fm = jax.block_until_ready(net_forward_fm(x.T, w1, b1, w2, b2))
    assert out_fm.shape == (3, B)
    assert jnp.allclose(out_fm.T, reference(x), atol=1e-4, rtol=1e-4)

    # Batch that exercises a multi-step grid and a masked partial final block
    # (no wrapper-side padding anywhere).
    B2 = 2500
    x2 = jax.random.normal(kx, (B2, 4), jnp.float32)
    out2 = jax.block_until_ready(net_forward(x2, w1, b1, w2, b2))
    assert out2.shape == (B2, 3)
    assert jnp.allclose(out2, reference(x2), atol=1e-4, rtol=1e-4)

    # bf16 log-probs: halves output HBM traffic; in-kernel math stays f32.
    out_bf16 = jax.block_until_ready(
        net_forward_fm(x2.T, w1, b1, w2, b2, out_dtype=jnp.bfloat16))
    assert out_bf16.dtype == jnp.bfloat16
    assert jnp.allclose(out_bf16.T.astype(jnp.float32), reference(x2),
                        atol=5e-2, rtol=5e-2)

    print("KERNEL_OK")
</pallas_src>

<mosaic_0001>
module attributes {stable_mosaic.version = 11 : i64} {
  func.func @kernel(%arg0: i32, %arg1: memref<4x8xf32, #tpu.memory_space<vmem>>, %arg2: memref<16x4xf32, #tpu.memory_space<vmem>>, %arg3: memref<16x1xf32, #tpu.memory_space<vmem>>, %arg4: memref<3x16xf32, #tpu.memory_space<vmem>>, %arg5: memref<3x1xf32, #tpu.memory_space<vmem>>, %arg6: memref<3x8xf32, #tpu.memory_space<vmem>>) attributes {dimension_semantics = [#tpu.dimension_semantics<parallel>], iteration_bounds = array<i64: 1>, scalar_prefetch = 0 : i64, scratch_operands = 0 : i64, tpu.core_type = #tpu.core_type<tc>, window_params = [{transform_indices = @transform_0, window_bounds = array<i64: 4, 8>}, {pipeline_mode = #tpu.pipeline_mode<synchronous>, transform_indices = @transform_1, window_bounds = array<i64: 16, 4>}, {pipeline_mode = #tpu.pipeline_mode<synchronous>, transform_indices = @transform_2, window_bounds = array<i64: 16, 1>}, {pipeline_mode = #tpu.pipeline_mode<synchronous>, transform_indices = @transform_3, window_bounds = array<i64: 3, 16>}, {pipeline_mode = #tpu.pipeline_mode<synchronous>, transform_indices = @transform_4, window_bounds = array<i64: 3, 1>}, {transform_indices = @transform_5, window_bounds = array<i64: 3, 8>}]} {
    %c0 = arith.constant 0 : index
    %c0_0 = arith.constant 0 : index
    %0 = vector.load %arg2[%c0, %c0_0] : memref<16x4xf32, #tpu.memory_space<vmem>>, vector<16x4xf32>
    %c0_1 = arith.constant 0 : index
    %c0_2 = arith.constant 0 : index
    %1 = vector.load %arg3[%c0_1, %c0_2] : memref<16x1xf32, #tpu.memory_space<vmem>>, vector<16x1xf32>
    %c0_3 = arith.constant 0 : index
    %c0_4 = arith.constant 0 : index
    %2 = vector.load %arg4[%c0_3, %c0_4] : memref<3x16xf32, #tpu.memory_space<vmem>>, vector<3x16xf32>
    %c0_5 = arith.constant 0 : index
    %c0_6 = arith.constant 0 : index
    %3 = vector.load %arg5[%c0_5, %c0_6] : memref<3x1xf32, #tpu.memory_space<vmem>>, vector<3x1xf32>
    %c0_7 = arith.constant 0 : index
    %c0_8 = arith.constant 0 : index
    %4 = vector.load %arg1[%c0_7, %c0_8] : memref<4x8xf32, #tpu.memory_space<vmem>>, vector<4x8xf32>
    %cst = arith.constant dense<0.000000e+00> : vector<16x8xf32>
    %5 = tpu.matmul %0, %4, %cst {dimension_numbers = #tpu.dot_dimension_numbers<[1], [0], [0], [1], [0, 0, 1, 1], [], []>} : vector<16x4xf32>, vector<4x8xf32>, vector<16x8xf32> -> vector<16x8xf32>
    %6 = vector.broadcast %1 : vector<16x1xf32> to vector<16x8xf32>
    %7 = arith.addf %5, %6 : vector<16x8xf32>
    %cst_9 = arith.constant 5.000000e-01 : f32
    %8 = vector.broadcast %cst_9 : f32 to vector<16x8xf32>
    %9 = arith.mulf %8, %7 : vector<16x8xf32>
    %10 = math.tanh %9 : vector<16x8xf32>
    %cst_10 = arith.constant 1.000000e+00 : f32
    %11 = vector.broadcast %cst_10 : f32 to vector<16x8xf32>
    %12 = arith.addf %10, %11 : vector<16x8xf32>
    %cst_11 = arith.constant 5.000000e-01 : f32
    %13 = vector.broadcast %cst_11 : f32 to vector<16x8xf32>
    %14 = arith.mulf %13, %12 : vector<16x8xf32>
    %cst_12 = arith.constant dense<0.000000e+00> : vector<3x8xf32>
    %15 = tpu.matmul %2, %14, %cst_12 {dimension_numbers = #tpu.dot_dimension_numbers<[1], [0], [0], [1], [0, 0, 1, 1], [], []>} : vector<3x16xf32>, vector<16x8xf32>, vector<3x8xf32> -> vector<3x8xf32>
    %16 = vector.broadcast %3 : vector<3x1xf32> to vector<3x8xf32>
    %17 = arith.addf %15, %16 : vector<3x8xf32>
    %18 = vector.extract_strided_slice %17 {offsets = [0, 0], sizes = [1, 8], strides = [1, 1]} : vector<3x8xf32> to vector<1x8xf32>
    %19 = vector.extract_strided_slice %17 {offsets = [1, 0], sizes = [1, 8], strides = [1, 1]} : vector<3x8xf32> to vector<1x8xf32>
    %20 = vector.extract_strided_slice %17 {offsets = [2, 0], sizes = [1, 8], strides = [1, 1]} : vector<3x8xf32> to vector<1x8xf32>
    %21 = arith.maximumf %18, %19 : vector<1x8xf32>
    %22 = arith.maximumf %21, %20 : vector<1x8xf32>
    %23 = arith.minimumf %18, %19 : vector<1x8xf32>
    %24 = arith.minimumf %23, %20 : vector<1x8xf32>
    %25 = arith.addf %18, %19 : vector<1x8xf32>
    %26 = arith.addf %25, %20 : vector<1x8xf32>
    %27 = arith.subf %26, %22 : vector<1x8xf32>
    %28 = arith.subf %27, %24 : vector<1x8xf32>
    %29 = arith.subf %24, %22 : vector<1x8xf32>
    %30 = math.exp %29 : vector<1x8xf32>
    %cst_13 = arith.constant 1.000000e+00 : f32
    %31 = vector.broadcast %cst_13 : f32 to vector<1x8xf32>
    %32 = arith.addf %31, %30 : vector<1x8xf32>
    %33 = arith.subf %28, %22 : vector<1x8xf32>
    %34 = math.exp %33 : vector<1x8xf32>
    %35 = arith.addf %32, %34 : vector<1x8xf32>
    %36 = math.log %35 : vector<1x8xf32>
    %37 = arith.addf %22, %36 : vector<1x8xf32>
    %38 = vector.broadcast %37 : vector<1x8xf32> to vector<3x8xf32>
    %39 = arith.subf %17, %38 : vector<3x8xf32>
    %c0_14 = arith.constant 0 : index
    %c0_15 = arith.constant 0 : index
    %40 = vector.load %arg6[%c0_14, %c0_15] : memref<3x8xf32, #tpu.memory_space<vmem>>, vector<3x8xf32>
    tpu.vector_store %arg6[%c0_14, %c0_15], %39 {strides = array<i32>} : memref<3x8xf32, #tpu.memory_space<vmem>>, vector<3x8xf32>,
    return
  }
  func.func @transform_0(%arg0: i32) -> (i32, i32) {
    %c0_i32 = arith.constant 0 : i32
    %c0_i32_0 = arith.constant 0 : i32
    return %c0_i32, %arg0 : i32, i32
  }
  func.func @transform_1(%arg0: i32) -> (i32, i32) {
    %c0_i32 = arith.constant 0 : i32
    %c0_i32_0 = arith.constant 0 : i32
    %c0_i32_1 = arith.constant 0 : i32
    return %c0_i32, %c0_i32_0 : i32, i32
  }
  func.func @transform_2(%arg0: i32) -> (i32, i32) {
    %c0_i32 = arith.constant 0 : i32
    %c0_i32_0 = arith.constant 0 : i32
    %c0_i32_1 = arith.constant 0 : i32
    return %c0_i32, %c0_i32_0 : i32, i32
  }
  func.func @transform_3(%arg0: i32) -> (i32, i32) {
    %c0_i32 = arith.constant 0 : i32
    %c0_i32_0 = arith.constant 0 : i32
    %c0_i32_1 = arith.constant 0 : i32
    return %c0_i32, %c0_i32_0 : i32, i32
  }
  func.func @transform_4(%arg0: i32) -> (i32, i32) {
    %c0_i32 = arith.constant 0 : i32
    %c0_i32_0 = arith.constant 0 : i32
    %c0_i32_1 = arith.constant 0 : i32
    return %c0_i32, %c0_i32_0 : i32, i32
  }
  func.func @transform_5(%arg0: i32) -> (i32, i32) {
    %c0_i32 = arith.constant 0 : i32
    %c0_i32_0 = arith.constant 0 : i32
    return %c0_i32, %arg0 : i32, i32
  }
}

</mosaic_0001>

<bundles_post_ra>
// kernel: tpu_custom_call.1
= control target key start
LH: loop header
LB: loop body
LE: loop exit
PB: predicated region body
PF: predicated region fallthrough
CT: control target
= control target key end

     0   :  { %vm45_vm0 = vcmask 1043456   ;;  %vm38_vm1 = vcmask 31744   ;;  %s390_s0 = inlined_call_operand.vmem [shape: f32[4,8], index: 0, kind: input, shape index: {}]   ;;  %s391_s1 = inlined_call_operand.vmem [shape: f32[16,4], index: 1, kind: input, shape index: {}]   ;;  %s392_s2 = inlined_call_operand.vmem [shape: f32[16,1], index: 2, kind: input, shape index: {}]   ;;  %s393_s3 = inlined_call_operand.vmem [shape: f32[3,16], index: 3, kind: input, shape index: {}]   ;;  %s394_s4 = inlined_call_operand.vmem [shape: f32[3,1], index: 4, kind: input, shape index: {}]   ;;  %s395_s5 = inlined_call_operand.hbm [shape: f32[3,8], index: 5, kind: output, shape index: {}]  }
   0x1   :  { %v27_v0 = vld [vmem:[%s390_s0] sm:$0xf]  ;;  %v22_v2 = vld [vmem:[%s391_s1 + $0x8] sm:$0xff] }
   0x2   :  { %v21_v1 = vld [vmem:[%s391_s1] sm:$0xff]  ;;  %266 = vmatprep.subr.msk.mxu0 %vm45_vm0, %v27_v0 }
   0x3   :  { %268 = vmatprep.mubr.msk.f32.mxu0 %vm38_vm1, %v21_v1  ;;  %v23_v3 = vld [vmem:[%s392_s2] sm:$0xff] }
   0x4   :  { %10 = vsyncpa [#allocation3], 0  ;;  %267 = vmatpush3.msk.msra.mxu0 %vm45_vm0, %v27_v0  ;;  %v322_v4 = vmov 0   ;;  %v24_v5 = vld [vmem:[%s392_s2 + $0x8] sm:$0xff]  ;;  %v323_v6 = vmov 0.0|0.0   ;;  %vm324_vm2 = vmmov 0   ;;  %v235_v47 = vlaneseq }
   0x5   :  { %286 = vset.pattern.permute.xlu0 %v322_v4  ;;  %269 = vmatmul.mubr.msk.f32.vlgmr.msra.gmra.mrb[0].mxu0 %vm38_vm1, %v22_v2  ;;  %v325_v7 = vmov 0.0   ;;  %v26_v8 = vld [vmem:[%s394_s4] sm:$0x7]  ;;  %vm137_vm3 = vcmask 130048   ;;  %vm240_vm4 = vcmask 59392  }
   0x6   :  { %30 = vperm.xlu0 %286, %v23_v3   ;;  %287 = vset.pattern.permute.xlu1 %v322_v4  ;;  %v25_v24 = vld [vmem:[%s393_s3] sm:$0x7]  ;;  %v236_v48 = vshrl.u32 %v235_v47, 7  ;;  %s326_s3 = smov [#allocation2]  }
   0x7   :  { %278 = vmatprep.subr.bf16.mxu1 %v323_v6  ;;  %275 = vmatprep.mubr.msk.f32.mxu1 %vm324_vm2, %v325_v7  ;;  %s248_s28 = sshll.u32 %s326_s3, 4  ;;  %s249_s28 = int_to_ptr.vmem [resolvable:$true] %s248_s28 }
   0x8   :  { %134 = vperm.xlu1 %287, %v26_v8   ;;  %v237_v51 = vsub.s32 0, %v236_v48  ;;  %s298_s29 = scalar_lea.vmem %s249_s28, 64  ;;  %p303_p1 = scmp.lt.s32.totalorder %s249_s28, %s249_s28 }
   0x9   :  { %p299_p0 = scmp.ne.s32.totalorder %s249_s28, %s298_s29  ;;  %p304_p2 = scmp.lt.s32.totalorder %s298_s29, %s298_s29 }
   0xa   :  { %35 = vperm.xlu0 %286, %v24_v5  }
   0xb   :  { %p305_p3 = por %p304_p2, %p303_p1 }
   0xd   :  { %p306_p4 = pnand %p305_p3, %p299_p0 }
  0x85   :  { %v31_v9 = vpop.permute.xlu0 %30 }
  0x87   :  { %v135_v25 = vpop.permute.xlu1 %134 }
  0x89   :  { %v36_v10 = vpop.permute.xlu0 %35 }
  0xd8   :  { %v270_v11 = vpop.f32.mrb[0].mxu0 }
  0xd9   :  { %v121_v12 = vadd.f32 %v270_v11, %v36_v10  ;;  %v115_v13 = vpop.f32.mrb[1].mxu0 }
  0xda   :  { %v116_v14 = vadd.f32 %v115_v13, %v31_v9 }
  0xdb   :  { %v125_v15 = vmul.f32 0.5, %v121_v12 }
  0xdc   :  { %v124_v16 = vmul.f32 0.5, %v116_v14 }
  0xdd   :  { %288 = vtanh.f32 %v125_v15 }
  0xde   :  { %290 = vtanh.f32 %v124_v16 }
  0xe7   :  { %v289_v17 = vpop.eup %288 }
  0xe8   :  { %v291_v18 = vpop.eup %290  ;;  %v129_v19 = vadd.f32 1.0, %v289_v17 }
  0xe9   :  { %v128_v20 = vadd.f32 1.0, %v291_v18 }
  0xea   :  { %v131_v21 = vmul.f32 0.5, %v129_v19 }
  0xeb   :  { %v130_v22 = vmul.f32 0.5, %v128_v20 }
  0xed   :  { %v279_v23 = vpack.c.bf16 %v131_v21, %v130_v22 }
  0xef   :  { %280 = vmatpush3.bf16.msra.mxu1 %v279_v23 }
  0xf2   :  { %276 = vmatmul.mubr.msk.f32.vlgmr.msra.gmra.mrb[0].mxu1 %vm137_vm3, %v25_v24 }
 0x1c5   :  { %v207_v26 = vpop.f32.mrb[0].mxu1 }
 0x1c6   :  { %v208_v27 = vadd.f32 %v207_v26, %v135_v25  ;;  %v277_v28 = vpop.f32.mrb[1].mxu1 }
 0x1c8   :  { %v212_v29 = vrot.slane %v208_v27, 1  ;;  %v215_v30 = vrot.slane %v208_v27, 2 }
 0x1ca   :  { %v218_v31 = vmin.f32 %v208_v27, %v212_v29  ;;  %v220_v32 = vadd.f32 %v212_v29, %v208_v27  ;;  %v214_v33 = vmax.f32 %v208_v27, %v212_v29 }
 0x1cc   :  { %v219_v34 = vmin.f32 %v218_v31, %v215_v30  ;;  %v221_v35 = vadd.f32 %v220_v32, %v215_v30  ;;  %v217_v36 = vmax.f32 %v214_v33, %v215_v30 }
 0x1ce   :  { %v222_v37 = vsub.f32 %v221_v35, %v217_v36  ;;  %v224_v38 = vsub.f32 %v219_v34, %v217_v36 }
 0x1d0   :  { %v223_v39 = vsub.f32 %v222_v37, %v219_v34  ;;  %v225_v40 = vmul.f32 1.442695, %v224_v38 }
 0x1d2   :  { %292 = vpow2.f32 %v225_v40  ;;  %v228_v41 = vsub.f32 %v223_v39, %v217_v36 }
 0x1d4   :  { %v229_v42 = vmul.f32 1.442695, %v228_v41 }
 0x1d6   :  { %294 = vpow2.f32 %v229_v42 }
 0x1dc   :  { %v293_v43 = vpop.eup %292 }
 0x1dd   :  { %v227_v44 = vadd.f32 1.0, %v293_v43 }
 0x1e0   :  { %v295_v45 = vpop.eup %294 }
 0x1e1   :  { %v231_v46 = vadd.f32 %v295_v45, %v227_v44 }
 0x1e3   :  { %296 = vlog2.f32 %v231_v46 }
 0x1ed   :  { %v297_v49 = vpop.eup %296 }
 0x1ee   :  { %v233_v50 = vmul.f32 0.6931472, %v297_v49 }
 0x1f0   :  { %v234_v52 = vadd.f32 %v233_v50, %v217_v36 }
 0x1f2   :  { %v238_v53 = vrot.slane %v234_v52, %v237_v51 }
 0x1f4   :  { %v239_v54 = vsub.f32 %v208_v27, %v238_v53 }
 0x1f6   :  { %241 = vst.msk [vmem:[#allocation2] sm:$0x7] %vm240_vm4, %v239_v54 }
 0x1f7   :  { %309 = shalt.err (!%p306_p4)
}
 0x1f8   :  { %s310_s7 = scalar_lea.hbm %s395_s5, 64 }
 0x1f9   :  { %p311_p5 = scmp.ne.s32.totalorder %s395_s5, %s310_s7  ;;  %p314_p6 = scmp.lt.u32.totalorder %s310_s7, %s395_s5 }
 0x1fb   :  { %p316_p7 = pnand %p314_p6, %p311_p5 }
 0x1fd   :  { %319 = shalt.err (!%p316_p7)
}
 0x1fe   :  { %251 = dma.vmem_to_hbm [thread:$0]  %s249_s28, 64, %s395_s5, [#allocation3]  }
 0x1ff   :  { %320 = dma.done.wait [#allocation3], 64  }
 0x200   :  { %321 = vsyncadd [#allocation3], 4294967232 }
 0x201   :  { %255 = vsyncpa [#allocation3], 1 }

</bundles_post_ra>
